<compile_context>
chip_gen: v5e
topology: v5e:2x2
jax: 0.10.0
libtpu: 0.0.40
codegen_flags: <defaults>
</compile_context>

<pallas_src>
import functools

import jax
import jax.numpy as jnp
from jax.experimental import pallas as pl
from jax.experimental.pallas import tpu as pltpu

N3 = 128  # lane-dense padded fc3 output width (min MXU tile; padding is free)


def mlp_kernel(x_ref, w1_ref, b1_ref, w2_ref, b2_ref, w3_ref, b3_ref, o_ref):
    # x arrives f32; cast to bf16 on the VPU (hidden under the MXU).
    xb = x_ref[...].astype(jnp.bfloat16)
    # fc1 -> relu  (bf16 MXU operands, f32 accumulate, f32 bias + ReLU)
    h1 = jnp.dot(xb, w1_ref[...], preferred_element_type=jnp.float32)
    h1 = jnp.maximum(h1 + b1_ref[...], 0.0).astype(jnp.bfloat16)
    # fc2 -> relu
    h2 = jnp.dot(h1, w2_ref[...], preferred_element_type=jnp.float32)
    h2 = jnp.maximum(h2 + b2_ref[...], 0.0).astype(jnp.bfloat16)
    # fc3 (padded to 128 output columns; pad columns are zero). Store bf16.
    out = jnp.dot(h2, w3_ref[...], preferred_element_type=jnp.float32)
    o_ref[...] = (out + b3_ref[...]).astype(o_ref.dtype)


def prepare_params(w1, b1, w2, b2, w3, b3):
    """One-time parameter prep: bf16 weights + lane-dense padded fc3."""
    out_dim = w3.shape[1]
    w3p = jnp.zeros((w3.shape[0], N3), jnp.bfloat16).at[:, :out_dim].set(
        w3.astype(jnp.bfloat16))
    b3p = jnp.zeros((1, N3), jnp.float32).at[:, :out_dim].set(
        b3.reshape(1, -1).astype(jnp.float32))
    return (w1.astype(jnp.bfloat16), b1.reshape(1, -1).astype(jnp.float32),
            w2.astype(jnp.bfloat16), b2.reshape(1, -1).astype(jnp.float32),
            w3p, b3p)


@functools.partial(jax.jit, static_argnames=("out_dim", "block_b"))
def net_forward(x, params, *, out_dim=5, block_b=512):
    w1b, b1, w2b, b2, w3p, b3p = params
    B, in_f = x.shape

    # Batch tile: full batch for tiny B (block == full dim is always legal);
    # otherwise a multiple of 16 (bf16 sublane packing), aiming for >=2 grid
    # steps so v7x's second TensorCore gets work, capped at block_b.
    if B <= 16:
        tb = B
    else:
        tb = min(block_b, max(16, ((pl.cdiv(B, 2) + 15) // 16) * 16))
    num_blocks = pl.cdiv(B, tb)

    def const_spec(shape):
        return pl.BlockSpec(shape, lambda i: (0,) * len(shape))

    bytes_accessed = (
        x.size * 4                      # f32 activations read
        + w1b.size * 2 + w2b.size * 2 + w3p.size * 2   # bf16 weights
        + b1.size * 4 + b2.size * 4 + b3p.size * 4     # f32 biases
        + B * N3 * 2)                   # bf16 padded output write
    flops = 2 * B * (in_f * 512 + 512 * 256 + 256 * N3)

    out = pl.pallas_call(
        mlp_kernel,
        out_shape=jax.ShapeDtypeStruct((B, N3), jnp.bfloat16),
        grid=(num_blocks,),
        in_specs=[
            pl.BlockSpec((tb, in_f), lambda i: (i, 0)),   # activation tile
            const_spec(w1b.shape), const_spec(b1.shape),  # weights VMEM-resident
            const_spec(w2b.shape), const_spec(b2.shape),
            const_spec(w3p.shape), const_spec(b3p.shape),
        ],
        out_specs=pl.BlockSpec((tb, N3), lambda i: (i, 0)),
        compiler_params=pltpu.CompilerParams(
            dimension_semantics=("parallel",)),
        cost_estimate=pl.CostEstimate(
            flops=flops, transcendentals=0, bytes_accessed=bytes_accessed),
    )(x, w1b, b1, w2b, b2, w3p, b3p)

    # Strip the zero-padded fc3 columns and return f32 logits.
    return out[:, :out_dim].astype(jnp.float32)


def init_params(key, in_features):
    # Deterministic synthetic init (Kaiming-uniform-ish, like torch.nn.Linear).
    def linear(k, fan_in, fan_out):
        kw, kb = jax.random.split(k)
        bound = 1.0 / jnp.sqrt(fan_in)
        w = jax.random.uniform(kw, (fan_in, fan_out), jnp.float32, -bound, bound)
        b = jax.random.uniform(kb, (1, fan_out), jnp.float32, -bound, bound)
        return w, b

    k1, k2, k3 = jax.random.split(key, 3)
    w1, b1 = linear(k1, in_features, 512)
    w2, b2 = linear(k2, 512, 256)
    w3, b3 = linear(k3, 256, 5)
    return w1, b1, w2, b2, w3, b3


def reference_forward(x, w1, b1, w2, b2, w3, b3):
    # Matches kernel numerics: bf16 matmul operands, f32 accumulate, bf16 store.
    h = jnp.maximum(jnp.dot(x.astype(jnp.bfloat16), w1.astype(jnp.bfloat16),
                            preferred_element_type=jnp.float32) + b1, 0.0)
    h = jnp.maximum(jnp.dot(h.astype(jnp.bfloat16), w2.astype(jnp.bfloat16),
                            preferred_element_type=jnp.float32) + b2, 0.0)
    out = jnp.dot(h.astype(jnp.bfloat16), w3.astype(jnp.bfloat16),
                  preferred_element_type=jnp.float32) + b3
    return out.astype(jnp.bfloat16).astype(jnp.float32)


if __name__ == "__main__":
    key = jax.random.PRNGKey(0)
    kx, kp = jax.random.split(key)

    batch, in_features = 8, 128
    x = jax.random.normal(kx, (batch, in_features), jnp.float32)
    raw_params = init_params(kp, in_features)
    params = prepare_params(*raw_params)      # one-time prep (hoisted off hot path)

    out = net_forward(x, params)
    out = jax.block_until_ready(out)

    ref = reference_forward(x, *raw_params)
    assert out.shape == (batch, 5), out.shape
    assert jnp.allclose(out, ref, atol=1e-2, rtol=1e-2), "mismatch vs reference"

    print("KERNEL_OK")
</pallas_src>

<mosaic_0001>
module attributes {stable_mosaic.version = 11 : i64} {
  func.func @mlp_kernel(%arg0: i32, %arg1: memref<8x128xf32, #tpu.memory_space<vmem>>, %arg2: memref<128x512xbf16, #tpu.memory_space<vmem>>, %arg3: memref<1x512xf32, #tpu.memory_space<vmem>>, %arg4: memref<512x256xbf16, #tpu.memory_space<vmem>>, %arg5: memref<1x256xf32, #tpu.memory_space<vmem>>, %arg6: memref<256x128xbf16, #tpu.memory_space<vmem>>, %arg7: memref<1x128xf32, #tpu.memory_space<vmem>>, %arg8: memref<8x128xbf16, #tpu.memory_space<vmem>>) attributes {dimension_semantics = [#tpu.dimension_semantics<parallel>], iteration_bounds = array<i64: 1>, scalar_prefetch = 0 : i64, scratch_operands = 0 : i64, tpu.core_type = #tpu.core_type<tc>, window_params = [{transform_indices = @transform_0, window_bounds = array<i64: 8, 128>}, {pipeline_mode = #tpu.pipeline_mode<synchronous>, transform_indices = @transform_1, window_bounds = array<i64: 128, 512>}, {pipeline_mode = #tpu.pipeline_mode<synchronous>, transform_indices = @transform_2, window_bounds = array<i64: 1, 512>}, {pipeline_mode = #tpu.pipeline_mode<synchronous>, transform_indices = @transform_3, window_bounds = array<i64: 512, 256>}, {pipeline_mode = #tpu.pipeline_mode<synchronous>, transform_indices = @transform_4, window_bounds = array<i64: 1, 256>}, {pipeline_mode = #tpu.pipeline_mode<synchronous>, transform_indices = @transform_5, window_bounds = array<i64: 256, 128>}, {pipeline_mode = #tpu.pipeline_mode<synchronous>, transform_indices = @transform_6, window_bounds = array<i64: 1, 128>}, {transform_indices = @transform_7, window_bounds = array<i64: 8, 128>}]} {
    %c0 = arith.constant 0 : index
    %c0_0 = arith.constant 0 : index
    %0 = vector.load %arg1[%c0, %c0_0] : memref<8x128xf32, #tpu.memory_space<vmem>>, vector<8x128xf32>
    %1 = arith.truncf %0 : vector<8x128xf32> to vector<8x128xbf16>
    %c0_1 = arith.constant 0 : index
    %c0_2 = arith.constant 0 : index
    %2 = vector.load %arg2[%c0_1, %c0_2] : memref<128x512xbf16, #tpu.memory_space<vmem>>, vector<128x512xbf16>
    %cst = arith.constant dense<0.000000e+00> : vector<8x512xf32>
    %3 = tpu.matmul %1, %2, %cst {dimension_numbers = #tpu.dot_dimension_numbers<[1], [0], [0], [1], [0, 0, 1, 1], [], []>} : vector<8x128xbf16>, vector<128x512xbf16>, vector<8x512xf32> -> vector<8x512xf32>
    %c0_3 = arith.constant 0 : index
    %c0_4 = arith.constant 0 : index
    %4 = vector.load %arg3[%c0_3, %c0_4] : memref<1x512xf32, #tpu.memory_space<vmem>>, vector<1x512xf32>
    %5 = vector.broadcast %4 : vector<1x512xf32> to vector<8x512xf32>
    %6 = arith.addf %3, %5 : vector<8x512xf32>
    %cst_5 = arith.constant 0.000000e+00 : f32
    %7 = vector.broadcast %cst_5 : f32 to vector<8x512xf32>
    %8 = arith.maximumf %6, %7 : vector<8x512xf32>
    %9 = arith.truncf %8 : vector<8x512xf32> to vector<8x512xbf16>
    %c0_6 = arith.constant 0 : index
    %c0_7 = arith.constant 0 : index
    %10 = vector.load %arg4[%c0_6, %c0_7] : memref<512x256xbf16, #tpu.memory_space<vmem>>, vector<512x256xbf16>
    %cst_8 = arith.constant dense<0.000000e+00> : vector<8x256xf32>
    %11 = tpu.matmul %9, %10, %cst_8 {dimension_numbers = #tpu.dot_dimension_numbers<[1], [0], [0], [1], [0, 0, 1, 1], [], []>} : vector<8x512xbf16>, vector<512x256xbf16>, vector<8x256xf32> -> vector<8x256xf32>
    %c0_9 = arith.constant 0 : index
    %c0_10 = arith.constant 0 : index
    %12 = vector.load %arg5[%c0_9, %c0_10] : memref<1x256xf32, #tpu.memory_space<vmem>>, vector<1x256xf32>
    %13 = vector.broadcast %12 : vector<1x256xf32> to vector<8x256xf32>
    %14 = arith.addf %11, %13 : vector<8x256xf32>
    %cst_11 = arith.constant 0.000000e+00 : f32
    %15 = vector.broadcast %cst_11 : f32 to vector<8x256xf32>
    %16 = arith.maximumf %14, %15 : vector<8x256xf32>
    %17 = arith.truncf %16 : vector<8x256xf32> to vector<8x256xbf16>
    %c0_12 = arith.constant 0 : index
    %c0_13 = arith.constant 0 : index
    %18 = vector.load %arg6[%c0_12, %c0_13] : memref<256x128xbf16, #tpu.memory_space<vmem>>, vector<256x128xbf16>
    %cst_14 = arith.constant dense<0.000000e+00> : vector<8x128xf32>
    %19 = tpu.matmul %17, %18, %cst_14 {dimension_numbers = #tpu.dot_dimension_numbers<[1], [0], [0], [1], [0, 0, 1, 1], [], []>} : vector<8x256xbf16>, vector<256x128xbf16>, vector<8x128xf32> -> vector<8x128xf32>
    %c0_15 = arith.constant 0 : index
    %c0_16 = arith.constant 0 : index
    %20 = vector.load %arg7[%c0_15, %c0_16] : memref<1x128xf32, #tpu.memory_space<vmem>>, vector<1x128xf32>
    %21 = vector.broadcast %20 : vector<1x128xf32> to vector<8x128xf32>
    %22 = arith.addf %19, %21 : vector<8x128xf32>
    %23 = arith.truncf %22 : vector<8x128xf32> to vector<8x128xbf16>
    %c0_17 = arith.constant 0 : index
    %c0_18 = arith.constant 0 : index
    %24 = vector.load %arg8[%c0_17, %c0_18] : memref<8x128xbf16, #tpu.memory_space<vmem>>, vector<8x128xbf16>
    tpu.vector_store %arg8[%c0_17, %c0_18], %23 {strides = array<i32>} : memref<8x128xbf16, #tpu.memory_space<vmem>>, vector<8x128xbf16>,
    return
  }
  func.func @transform_0(%arg0: i32) -> (i32, i32) {
    %c0_i32 = arith.constant 0 : i32
    %c0_i32_0 = arith.constant 0 : i32
    return %arg0, %c0_i32 : i32, i32
  }
  func.func @transform_1(%arg0: i32) -> (i32, i32) {
    %c0_i32 = arith.constant 0 : i32
    %c0_i32_0 = arith.constant 0 : i32
    %c0_i32_1 = arith.constant 0 : i32
    return %c0_i32, %c0_i32_0 : i32, i32
  }
  func.func @transform_2(%arg0: i32) -> (i32, i32) {
    %c0_i32 = arith.constant 0 : i32
    %c0_i32_0 = arith.constant 0 : i32
    %c0_i32_1 = arith.constant 0 : i32
    return %c0_i32, %c0_i32_0 : i32, i32
  }
  func.func @transform_3(%arg0: i32) -> (i32, i32) {
    %c0_i32 = arith.constant 0 : i32
    %c0_i32_0 = arith.constant 0 : i32
    %c0_i32_1 = arith.constant 0 : i32
    return %c0_i32, %c0_i32_0 : i32, i32
  }
  func.func @transform_4(%arg0: i32) -> (i32, i32) {
    %c0_i32 = arith.constant 0 : i32
    %c0_i32_0 = arith.constant 0 : i32
    %c0_i32_1 = arith.constant 0 : i32
    return %c0_i32, %c0_i32_0 : i32, i32
  }
  func.func @transform_5(%arg0: i32) -> (i32, i32) {
    %c0_i32 = arith.constant 0 : i32
    %c0_i32_0 = arith.constant 0 : i32
    %c0_i32_1 = arith.constant 0 : i32
    return %c0_i32, %c0_i32_0 : i32, i32
  }
  func.func @transform_6(%arg0: i32) -> (i32, i32) {
    %c0_i32 = arith.constant 0 : i32
    %c0_i32_0 = arith.constant 0 : i32
    %c0_i32_1 = arith.constant 0 : i32
    return %c0_i32, %c0_i32_0 : i32, i32
  }
  func.func @transform_7(%arg0: i32) -> (i32, i32) {
    %c0_i32 = arith.constant 0 : i32
    %c0_i32_0 = arith.constant 0 : i32
    return %arg0, %c0_i32 : i32, i32
  }
}

</mosaic_0001>

<bundles_post_ra>
// kernel: net_forward.1
= control target key start
LH: loop header
LB: loop body
LE: loop exit
PB: predicated region body
PF: predicated region fallthrough
CT: control target
= control target key end

     0   :  { %12 = vsyncpa [#allocation3], 0  ;;  %s1802_s0 = inlined_call_operand.hbm [shape: f32[8,128], index: 0, kind: input, shape index: {}]   ;;  %s1803_s1 = inlined_call_operand.hbm [shape: bf16[128,512], index: 1, kind: input, shape index: {}]   ;;  %s1804_s2 = inlined_call_operand.hbm [shape: f32[1,512], index: 2, kind: input, shape index: {}]   ;;  %s1805_s3 = inlined_call_operand.hbm [shape: bf16[512,256], index: 3, kind: input, shape index: {}]   ;;  %s1806_s4 = inlined_call_operand.vmem [shape: f32[1,256], index: 4, kind: input, shape index: {}]   ;;  %s1807_s5 = inlined_call_operand.hbm [shape: bf16[256,128], index: 5, kind: input, shape index: {}]   ;;  %s1808_s6 = inlined_call_operand.vmem [shape: f32[1,128], index: 6, kind: input, shape index: {}]   ;;  %s1809_s7 = inlined_call_operand.vmem [shape: bf16[8,128], index: 7, kind: output, shape index: {}]  }
   0x1   :  { %13 = vsyncpa [#allocation5], 0  ;;  %s30_s26 = sshll.u32 %s1803_s1, 4  ;;  %s31_s26 = int_to_ptr.hbm [resolvable:$true] %s30_s26 }
   0x2   :  { %14 = vsyncpa [#allocation8], 0  ;;  %s1727_s27 = smov [#allocation4]   ;;  %s54_s8 = sshll.u32 %s1805_s3, 4  ;;  %s55_s8 = int_to_ptr.hbm [resolvable:$true] %s54_s8 }
   0x3   :  { %s32_s28 = sshll.u32 %s1727_s27, 4  ;;  %s1728_s9 = smov 256   ;;  %s33_s28 = int_to_ptr.vmem [resolvable:$true] %s32_s28 }
   0x4   :  { %s1729_s10 = smov 16   ;;  %s1730_s11 = smov [#allocation7]  }
   0x5   :  { %38 = dma.hbm_to_vmem [thread:$0]  %s31_s26, 4096, %s33_s28, [#allocation5], %s1728_s9, %s1728_s9, %s1729_s10  }
   0x6   :  { %s56_s12 = sshll.u32 %s1730_s11, 4  ;;  %s1731_s13 = smov 128   ;;  %s57_s12 = int_to_ptr.vmem [resolvable:$true] %s56_s12 }
   0x7   :  { %s1732_s14 = smov 8   ;;  %s20_s16 = sshll.u32 %s1802_s0, 4  ;;  %s21_s16 = int_to_ptr.hbm [resolvable:$true] %s20_s16 }
   0x8   :  { %62 = dma.hbm_to_vmem [thread:$0]  %s55_s8, 8192, %s57_s12, [#allocation8], %s1731_s13, %s1731_s13, %s1732_s14  }
   0x9   :  { %s1733_s17 = smov [#allocation2]   ;;  %s44_s20 = sshll.u32 %s1804_s2, 4  ;;  %s45_s20 = int_to_ptr.hbm [resolvable:$true] %s44_s20 }
   0xa   :  { %s22_s18 = sshll.u32 %s1733_s17, 4  ;;  %s1734_s21 = smov [#allocation6]   ;;  %s23_s18 = int_to_ptr.vmem [resolvable:$true] %s22_s18 }
   0xb   :  { %25 = dma.hbm_to_vmem [thread:$0]  %s21_s16, 128, %s23_s18, [#allocation3]  }
   0xc   :  { %s46_s22 = sshll.u32 %s1734_s21, 4  ;;  %s69_s25 = sshll.u32 %s1807_s5, 4  ;;  %s47_s22 = int_to_ptr.vmem [resolvable:$true] %s46_s22  ;;  %s70_s25 = int_to_ptr.hbm [resolvable:$true] %s69_s25 }
   0xd   :  { %49 = dma.hbm_to_vmem [thread:$0]  %s45_s20, 64, %s47_s22, [#allocation5]  }
   0xe   :  { %s1735_s0 = smov [#allocation9]   ;;  %s1736_s27 = smov 64  }
   0xf   :  { %s71_s26 = sshll.u32 %s1735_s0, 4  ;;  %s1737_s28 = smov 4   ;;  %s72_s26 = int_to_ptr.vmem [resolvable:$true] %s71_s26 }
  0x10   :  { %77 = dma.hbm_to_vmem [thread:$0]  %s70_s25, 2048, %s72_s26, [#allocation8], %s1736_s27, %s1736_s27, %s1737_s28  }
  0x11   :  { %1721 = dma.done.wait [#allocation3], 128  }
  0x12   :  { %1722 = vsyncadd [#allocation3], 4294967168 }
  0x13   :  { %1723 = dma.done.wait [#allocation5], 4160  }
  0x14   :  { %1724 = vsyncadd [#allocation5], 4294963136 }
  0x15   :  { %1725 = dma.done.wait [#allocation8], 10240  }
  0x16   :  { %1726 = vsyncadd [#allocation8], 4294957056  ;;  %v1143_v0 = vld [vmem:[#allocation4 + $0xe0] sm:$0xf]  ;;  %v1507_v1 = vld [vmem:[#allocation4 + $0xec] sm:$0xf0] }
  0x17   :  { %v1505_v2 = vld [vmem:[#allocation4 + $0xe4] sm:$0xf]  ;;  %v1144_v3 = vor.u32 %v1507_v1, %v1143_v0  ;;  %v1145_v4 = vld [vmem:[#allocation4 + $0xf0] sm:$0xf0]  ;;  %v1151_v5 = vld [vmem:[#allocation4 + $0xe8] sm:$0xf] }
  0x18   :  { %v1508_v6 = vld [vmem:[#allocation4 + $0xf4] sm:$0xf0]  ;;  %v1148_v7 = vor.u32 %v1505_v2, %v1145_v4  ;;  %v1506_v9 = vld [vmem:[#allocation4 + $0xec] sm:$0xf]  ;;  %v1153_v10 = vld [vmem:[#allocation4 + $0xf8] sm:$0xf0] }
  0x19   :  { %v1152_v8 = vor.u32 %v1508_v6, %v1151_v5  ;;  %v1127_v11 = vld [vmem:[#allocation4 + $0xc0] sm:$0xf]  ;;  %304 = vmatpush.bf16.msra.mxu0 %v1144_v3  ;;  %v1156_v12 = vor.u32 %v1506_v9, %v1153_v10  ;;  %v1503_v13 = vld [vmem:[#allocation4 + $0xcc] sm:$0xf0]  ;;  %v1501_v14 = vld [vmem:[#allocation4 + $0xc4] sm:$0xf] }
  0x1a   :  { %v1129_v15 = vld [vmem:[#allocation4 + $0xd0] sm:$0xf0]  ;;  %317 = vmatpush.bf16.msra.mxu1 %v1148_v7  ;;  %v1128_v16 = vor.u32 %v1503_v13, %v1127_v11  ;;  %v1135_v18 = vld [vmem:[#allocation4 + $0xc8] sm:$0xf]  ;;  %v1504_v19 = vld [vmem:[#allocation4 + $0xd4] sm:$0xf0] }
  0x1b   :  { %330 = vmatpush.bf16.msra.mxu2 %v1152_v8  ;;  %v1132_v17 = vor.u32 %v1501_v14, %v1129_v15  ;;  %v1502_v20 = vld [vmem:[#allocation4 + $0xcc] sm:$0xf]  ;;  %343 = vmatpush.bf16.msra.mxu3 %v1156_v12  ;;  %v1136_v21 = vor.u32 %v1504_v19, %v1135_v18  ;;  %v1137_v22 = vld [vmem:[#allocation4 + $0xd8] sm:$0xf0]  ;;  %v1111_v23 = vld [vmem:[#allocation4 + $0xa0] sm:$0xf] }
  0x1c   :  { %v1499_v24 = vld [vmem:[#allocation4 + $0xac] sm:$0xf0]  ;;  %v1140_v25 = vor.u32 %v1502_v20, %v1137_v22  ;;  %v1497_v26 = vld [vmem:[#allocation4 + $0xa4] sm:$0xf]  ;;  %v1113_v27 = vld [vmem:[#allocation4 + $0xb0] sm:$0xf0] }
  0x1d   :  { %v1119_v28 = vld [vmem:[#allocation4 + $0xa8] sm:$0xf]  ;;  %305 = vmatpush.bf16.msra.mxu0 %v1128_v16  ;;  %v1112_v29 = vor.u32 %v1499_v24, %v1111_v23  ;;  %v1500_v30 = vld [vmem:[#allocation4 + $0xb4] sm:$0xf0]  ;;  %v1498_v31 = vld [vmem:[#allocation4 + $0xac] sm:$0xf]  ;;  %v1116_v33 = vor.u32 %v1497_v26, %v1113_v27 }
  0x1e   :  { %v1121_v32 = vld [vmem:[#allocation4 + $0xb8] sm:$0xf0]  ;;  %318 = vmatpush.bf16.msra.mxu1 %v1132_v17  ;;  %v1120_v34 = vor.u32 %v1500_v30, %v1119_v28  ;;  %v1095_v35 = vld [vmem:[#allocation4 + $0x80] sm:$0xf]  ;;  %v1495_v36 = vld [vmem:[#allocation4 + $0x8c] sm:$0xf0] }
  0x1f   :  { %331 = vmatpush.bf16.msra.mxu2 %v1136_v21  ;;  %v1493_v37 = vld [vmem:[#allocation4 + $0x84] sm:$0xf]  ;;  %344 = vmatpush.bf16.msra.mxu3 %v1140_v25  ;;  %v1124_v38 = vor.u32 %v1498_v31, %v1121_v32  ;;  %v1097_v39 = vld [vmem:[#allocation4 + $0x90] sm:$0xf0]  ;;  %v1103_v40 = vld [vmem:[#allocation4 + $0x88] sm:$0xf]  ;;  %v1096_v44 = vor.u32 %v1495_v36, %v1095_v35 }
  0x20   :  { %v1496_v41 = vld [vmem:[#allocation4 + $0x94] sm:$0xf0]  ;;  %v1494_v42 = vld [vmem:[#allocation4 + $0x8c] sm:$0xf]  ;;  %v1105_v43 = vld [vmem:[#allocation4 + $0x98] sm:$0xf0]  ;;  %v1100_v45 = vor.u32 %v1493_v37, %v1097_v39 }
  0x21   :  { %306 = vmatpush.bf16.msra.mxu0 %v1112_v29  ;;  %v1104_v46 = vor.u32 %v1496_v41, %v1103_v40  ;;  %v1079_v47 = vld [vmem:[#allocation4 + $0x60] sm:$0xf]  ;;  %v1491_v48 = vld [vmem:[#allocation4 + $0x6c] sm:$0xf0]  ;;  %v1489_v49 = vld [vmem:[#allocation4 + $0x64] sm:$0xf]  ;;  %v1108_v50 = vor.u32 %v1494_v42, %v1105_v43 }
  0x22   :  { %319 = vmatpush.bf16.msra.mxu1 %v1116_v33  ;;  %v1081_v51 = vld [vmem:[#allocation4 + $0x70] sm:$0xf0]  ;;  %v1087_v52 = vld [vmem:[#allocation4 + $0x68] sm:$0xf]  ;;  %v1492_v53 = vld [vmem:[#allocation4 + $0x74] sm:$0xf0]  ;;  %v1080_v56 = vor.u32 %v1491_v48, %v1079_v47 }
  0x23   :  { %332 = vmatpush.bf16.msra.mxu2 %v1120_v34  ;;  %345 = vmatpush.bf16.msra.mxu3 %v1124_v38  ;;  %v1490_v54 = vld [vmem:[#allocation4 + $0x6c] sm:$0xf]  ;;  %v1089_v55 = vld [vmem:[#allocation4 + $0x78] sm:$0xf0]  ;;  %v1084_v57 = vor.u32 %v1489_v49, %v1081_v51  ;;  %v1088_v58 = vor.u32 %v1492_v53, %v1087_v52  ;;  %v1063_v59 = vld [vmem:[#allocation4 + $0x40] sm:$0xf] }
  0x24   :  { %v1487_v60 = vld [vmem:[#allocation4 + $0x4c] sm:$0xf0]  ;;  %v1485_v61 = vld [vmem:[#allocation4 + $0x44] sm:$0xf]  ;;  %v1092_v62 = vor.u32 %v1490_v54, %v1089_v55  ;;  %v1065_v63 = vld [vmem:[#allocation4 + $0x50] sm:$0xf0] }
  0x25   :  { %307 = vmatpush.bf16.msra.mxu0 %v1096_v44  ;;  %v1071_v0 = vld [vmem:[#allocation4 + $0x48] sm:$0xf]  ;;  %v1488_v1 = vld [vmem:[#allocation4 + $0x54] sm:$0xf0]  ;;  %v1486_v2 = vld [vmem:[#allocation4 + $0x4c] sm:$0xf]  ;;  %v1064_v4 = vor.u32 %v1487_v60, %v1063_v59  ;;  %v1068_v5 = vor.u32 %v1485_v61, %v1065_v63 }
  0x26   :  { %320 = vmatpush.bf16.msra.mxu1 %v1100_v45  ;;  %v1073_v3 = vld [vmem:[#allocation4 + $0x58] sm:$0xf0]  ;;  %v1072_v6 = vor.u32 %v1488_v1, %v1071_v0  ;;  %v1047_v7 = vld [vmem:[#allocation4 + $0x20] sm:$0xf]  ;;  %v1483_v8 = vld [vmem:[#allocation4 + $0x2c] sm:$0xf0] }
  0x27   :  { %333 = vmatpush.bf16.msra.mxu2 %v1104_v46  ;;  %346 = vmatpush.bf16.msra.mxu3 %v1108_v50  ;;  %v1481_v9 = vld [vmem:[#allocation4 + $0x24] sm:$0xf]  ;;  %v1076_v10 = vor.u32 %v1486_v2, %v1073_v3  ;;  %v1049_v11 = vld [vmem:[#allocation4 + $0x30] sm:$0xf0]  ;;  %v1055_v12 = vld [vmem:[#allocation4 + $0x28] sm:$0xf]  ;;  %v1048_v16 = vor.u32 %v1483_v8, %v1047_v7 }
  0x28   :  { %v1484_v13 = vld [vmem:[#allocation4 + $0x34] sm:$0xf0]  ;;  %v1482_v14 = vld [vmem:[#allocation4 + $0x2c] sm:$0xf]  ;;  %v1057_v15 = vld [vmem:[#allocation4 + $0x38] sm:$0xf0]  ;;  %v1052_v18 = vor.u32 %v1481_v9, %v1049_v11 }
  0x29   :  { %308 = vmatpush.bf16.msra.mxu0 %v1080_v56  ;;  %v1031_v17 = vld [vmem:[#allocation4] sm:$0xf]  ;;  %v1056_v19 = vor.u32 %v1484_v13, %v1055_v12  ;;  %v1479_v20 = vld [vmem:[#allocation4 + $0xc] sm:$0xf0]  ;;  %v1477_v21 = vld [vmem:[#allocation4 + $0x4] sm:$0xf]  ;;  %v1060_v23 = vor.u32 %v1482_v14, %v1057_v15 }
  0x2a   :  { %321 = vmatpush.bf16.msra.mxu1 %v1084_v57  ;;  %v1033_v22 = vld [vmem:[#allocation4 + $0x10] sm:$0xf0]  ;;  %v1039_v24 = vld [vmem:[#allocation4 + $0x8] sm:$0xf]  ;;  %v1480_v25 = vld [vmem:[#allocation4 + $0x14] sm:$0xf0]  ;;  %v1032_v30 = vor.u32 %v1479_v20, %v1031_v17 }
  0x2b   :  { %334 = vmatpush.bf16.msra.mxu2 %v1088_v58  ;;  %347 = vmatpush.bf16.msra.mxu3 %v1092_v62  ;;  %v1478_v26 = vld [vmem:[#allocation4 + $0xc] sm:$0xf]  ;;  %v1041_v27 = vld [vmem:[#allocation4 + $0x18] sm:$0xf0]  ;;  %v1215_v28 = vld [vmem:[#allocation7 + $0x70] sm:$0xf]  ;;  %v1036_v34 = vor.u32 %v1477_v21, %v1033_v22  ;;  %v1040_v35 = vor.u32 %v1480_v25, %v1039_v24 }
  0x2c   :  { %v1524_v29 = vld [vmem:[#allocation7 + $0x74] sm:$0xf0]  ;;  %v1279_v32 = vld [vmem:[#allocation7 + $0xf0] sm:$0xf]  ;;  %v1044_v36 = vor.u32 %v1478_v26, %v1041_v27  ;;  %v1207_v38 = vld [vmem:[#allocation7 + $0x60] sm:$0xf] }
  0x2d   :  { %309 = vmatpush.bf16.msra.mxu0 %v1064_v4  ;;  %v100_v31 = vld [vmem:[#allocation2] sm:$0xff]  ;;  %v1216_v37 = vor.u32 %v1524_v29, %v1215_v28  ;;  %v1343_v39 = vld [vmem:[#allocation7 + $0x170] sm:$0xf]  ;;  %v1522_v43 = vld [vmem:[#allocation7 + $0x64] sm:$0xf0] }
  0x2e   :  { %322 = vmatpush.bf16.msra.mxu1 %v1068_v5  ;;  %v1540_v33 = vld [vmem:[#allocation7 + $0xf4] sm:$0xf0]  ;;  %v101_v41 = vpack.c.bf16 %v100_v31, %v100_v31  ;;  %v1407_v44 = vld [vmem:[#allocation7 + $0x1f0] sm:$0xf]  ;;  %v1271_v46 = vld [vmem:[#allocation7 + $0xe0] sm:$0xf]  ;;  %v1208_v49 = vor.u32 %v1522_v43, %v1207_v38 }
  0x2f   :  { %335 = vmatpush.bf16.msra.mxu2 %v1072_v6  ;;  %348 = vmatpush.bf16.msra.mxu3 %v1076_v10  ;;  %v1556_v40 = vld [vmem:[#allocation7 + $0x174] sm:$0xf0]  ;;  %v1280_v42 = vor.u32 %v1540_v33, %v1279_v32  ;;  %v1538_v47 = vld [vmem:[#allocation7 + $0xe4] sm:$0xf0]  ;;  %v1199_v51 = vld [vmem:[#allocation7 + $0x50] sm:$0xf] }
  0x30   :  { %v1572_v45 = vld [vmem:[#allocation7 + $0x1f4] sm:$0xf0]  ;;  %v1344_v48 = vor.u32 %v1556_v40, %v1343_v39  ;;  %v1335_v52 = vld [vmem:[#allocation7 + $0x160] sm:$0xf]  ;;  %v1554_v53 = vld [vmem:[#allocation7 + $0x164] sm:$0xf0]  ;;  %v1272_v54 = vor.u32 %v1538_v47, %v1271_v46 }
  0x31   :  { %310 = vmatpush.bf16.msra.mxu0 %v1048_v16  ;;  %v1408_v50 = vor.u32 %v1572_v45, %v1407_v44  ;;  %v1520_v55 = vld [vmem:[#allocation7 + $0x54] sm:$0xf0]  ;;  %v1399_v56 = vld [vmem:[#allocation7 + $0x1e0] sm:$0xf]  ;;  %v1570_v57 = vld [vmem:[#allocation7 + $0x1e4] sm:$0xf0]  ;;  %v1336_v60 = vor.u32 %v1554_v53, %v1335_v52 }
  0x32   :  { %323 = vmatpush.bf16.msra.mxu1 %v1052_v18  ;;  %v1263_v58 = vld [vmem:[#allocation7 + $0xd0] sm:$0xf]  ;;  %v1536_v59 = vld [vmem:[#allocation7 + $0xd4] sm:$0xf0]  ;;  %v1200_v61 = vor.u32 %v1520_v55, %v1199_v51  ;;  %v1400_v62 = vor.u32 %v1570_v57, %v1399_v56  ;;  %v1191_v63 = vld [vmem:[#allocation7 + $0x40] sm:$0xf] }
  0x33   :  { %336 = vmatpush.bf16.msra.mxu2 %v1056_v19  ;;  %349 = vmatpush.bf16.msra.mxu3 %v1060_v23  ;;  %v1327_v0 = vld [vmem:[#allocation7 + $0x150] sm:$0xf]  ;;  %v1552_v1 = vld [vmem:[#allocation7 + $0x154] sm:$0xf0]  ;;  %v1264_v2 = vor.u32 %v1536_v59, %v1263_v58  ;;  %v1518_v3 = vld [vmem:[#allocation7 + $0x44] sm:$0xf0] }
  0x34   :  { %v1391_v4 = vld [vmem:[#allocation7 + $0x1d0] sm:$0xf]  ;;  %v1568_v5 = vld [vmem:[#allocation7 + $0x1d4] sm:$0xf0]  ;;  %v1255_v6 = vld [vmem:[#allocation7 + $0xc0] sm:$0xf]  ;;  %v1328_v8 = vor.u32 %v1552_v1, %v1327_v0  ;;  %v1192_v9 = vor.u32 %v1518_v3, %v1191_v63 }
  0x35   :  { %311 = vmatpush.bf16.msra.mxu0 %v1032_v30  ;;  %v1534_v7 = vld [vmem:[#allocation7 + $0xc4] sm:$0xf0]  ;;  %v1392_v10 = vor.u32 %v1568_v5, %v1391_v4  ;;  %v1183_v11 = vld [vmem:[#allocation7 + $0x30] sm:$0xf]  ;;  %v1319_v12 = vld [vmem:[#allocation7 + $0x140] sm:$0xf] }
  0x36   :  { %324 = vmatpush.bf16.msra.mxu1 %v1036_v34  ;;  %v1550_v13 = vld [vmem:[#allocation7 + $0x144] sm:$0xf0]  ;;  %v1256_v14 = vor.u32 %v1534_v7, %v1255_v6  ;;  %v1516_v15 = vld [vmem:[#allocation7 + $0x34] sm:$0xf0]  ;;  %v1383_v16 = vld [vmem:[#allocation7 + $0x1c0] sm:$0xf] }
  0x37   :  { %337 = vmatpush.bf16.msra.mxu2 %v1040_v35  ;;  %350 = vmatpush.bf16.msra.mxu3 %v1044_v36  ;;  %v1566_v17 = vld [vmem:[#allocation7 + $0x1c4] sm:$0xf0]  ;;  %v1247_v18 = vld [vmem:[#allocation7 + $0xb0] sm:$0xf]  ;;  %v1532_v19 = vld [vmem:[#allocation7 + $0xb4] sm:$0xf0]  ;;  %v1320_v20 = vor.u32 %v1550_v13, %v1319_v12  ;;  %v1184_v21 = vor.u32 %v1516_v15, %v1183_v11 }
  0x38   :  { %312 = vmatmul.bf16.vlgmr.msra.gmra.mxu0 %v101_v41  ;;  %v1384_v22 = vor.u32 %v1566_v17, %v1383_v16  ;;  %v1175_v23 = vld [vmem:[#allocation7 + $0x20] sm:$0xf]  ;;  %v1311_v24 = vld [vmem:[#allocation7 + $0x130] sm:$0xf]  ;;  %v1548_v25 = vld [vmem:[#allocation7 + $0x134] sm:$0xf0]  ;;  %v1248_v26 = vor.u32 %v1532_v19, %v1247_v18 }
  0x39   :  { %754 = vmatpush.bf16.msrb.mxu0 %v1216_v37  ;;  %325 = vmatmul.bf16.vlgmr.msra.gmra.mxu1 %v101_v41  ;;  %v1514_v27 = vld [vmem:[#allocation7 + $0x24] sm:$0xf0]  ;;  %v1375_v28 = vld [vmem:[#allocation7 + $0x1b0] sm:$0xf]  ;;  %v1564_v29 = vld [vmem:[#allocation7 + $0x1b4] sm:$0xf0]  ;;  %v1312_v32 = vor.u32 %v1548_v25, %v1311_v24 }
  0x3a   :  { %767 = vmatpush.bf16.msrb.mxu1 %v1280_v42  ;;  %338 = vmatmul.bf16.vlgmr.msra.gmra.mxu2 %v101_v41  ;;  %v1239_v30 = vld [vmem:[#allocation7 + $0xa0] sm:$0xf]  ;;  %v1530_v31 = vld [vmem:[#allocation7 + $0xa4] sm:$0xf0]  ;;  %v1176_v33 = vor.u32 %v1514_v27, %v1175_v23  ;;  %v1376_v34 = vor.u32 %v1564_v29, %v1375_v28  ;;  %v1167_v35 = vld [vmem:[#allocation7 + $0x10] sm:$0xf] }
  0x3b   :  { %351 = vmatmul.bf16.vlgmr.msra.gmra.mxu3 %v101_v41  ;;  %780 = vmatpush.bf16.msrb.mxu2 %v1344_v48  ;;  %v1303_v36 = vld [vmem:[#allocation7 + $0x120] sm:$0xf]  ;;  %v1546_v37 = vld [vmem:[#allocation7 + $0x124] sm:$0xf0]  ;;  %v1240_v38 = vor.u32 %v1530_v31, %v1239_v30  ;;  %v1512_v39 = vld [vmem:[#allocation7 + $0x14] sm:$0xf0] }
  0x3c   :  { %793 = vmatpush.bf16.msrb.mxu3 %v1408_v50  ;;  %v1367_v40 = vld [vmem:[#allocation7 + $0x1a0] sm:$0xf]  ;;  %v1562_v41 = vld [vmem:[#allocation7 + $0x1a4] sm:$0xf0]  ;;  %v1231_v42 = vld [vmem:[#allocation7 + $0x90] sm:$0xf]  ;;  %v1304_v44 = vor.u32 %v1546_v37, %v1303_v36  ;;  %v1168_v46 = vor.u32 %v1512_v39, %v1167_v35 }
  0x3d   :  { %755 = vmatpush.bf16.msrb.mxu0 %v1208_v49  ;;  %v1528_v43 = vld [vmem:[#allocation7 + $0x94] sm:$0xf0]  ;;  %v1159_v45 = vld [vmem:[#allocation7] sm:$0xf]  ;;  %v1368_v47 = vor.u32 %v1562_v41, %v1367_v40  ;;  %v1510_v48 = vld [vmem:[#allocation7 + $0x4] sm:$0xf0] }
  0x3e   :  { %768 = vmatpush.bf16.msrb.mxu1 %v1272_v54  ;;  %v1295_v49 = vld [vmem:[#allocation7 + $0x110] sm:$0xf]  ;;  %v1544_v50 = vld [vmem:[#allocation7 + $0x114] sm:$0xf0]  ;;  %v1232_v51 = vor.u32 %v1528_v43, %v1231_v42  ;;  %v1223_v52 = vld [vmem:[#allocation7 + $0x80] sm:$0xf] }
  0x3f   :  { %781 = vmatpush.bf16.msrb.mxu2 %v1336_v60  ;;  %v1359_v53 = vld [vmem:[#allocation7 + $0x190] sm:$0xf]  ;;  %v1560_v54 = vld [vmem:[#allocation7 + $0x194] sm:$0xf0]  ;;  %v1526_v55 = vld [vmem:[#allocation7 + $0x84] sm:$0xf0]  ;;  %v1296_v60 = vor.u32 %v1544_v50, %v1295_v49 }
  0x40   :  { %794 = vmatpush.bf16.msrb.mxu3 %v1400_v62  ;;  %v1523_v56 = vld [vmem:[#allocation7 + $0x74] sm:$0xf]  ;;  %v1217_v57 = vld [vmem:[#allocation7 + $0x78] sm:$0xf0]  ;;  %v1360_v62 = vor.u32 %v1560_v54, %v1359_v53  ;;  %v1521_v63 = vld [vmem:[#allocation7 + $0x64] sm:$0xf]  ;;  %v1224_v3 = vor.u32 %v1526_v55, %v1223_v52 }
  0x41   :  { %756 = vmatpush.bf16.msrb.mxu0 %v1200_v61  ;;  %v1539_v58 = vld [vmem:[#allocation7 + $0xf4] sm:$0xf]  ;;  %v1281_v59 = vld [vmem:[#allocation7 + $0xf8] sm:$0xf0]  ;;  %v1160_v61 = vor.u32 %v1510_v48, %v1159_v45  ;;  %v1287_v0 = vld [vmem:[#allocation7 + $0x100] sm:$0xf]  ;;  %v1220_v4 = vor.u32 %v1523_v56, %v1217_v57 }
  0x42   :  { %769 = vmatpush.bf16.msrb.mxu1 %v1264_v2  ;;  %v1542_v1 = vld [vmem:[#allocation7 + $0x104] sm:$0xf0]  ;;  %v1351_v2 = vld [vmem:[#allocation7 + $0x180] sm:$0xf]  ;;  %v1555_v6 = vld [vmem:[#allocation7 + $0x174] sm:$0xf] }
  0x43   :  { %782 = vmatpush.bf16.msrb.mxu2 %v1328_v8  ;;  %v1558_v5 = vld [vmem:[#allocation7 + $0x184] sm:$0xf0]  ;;  %v1345_v7 = vld [vmem:[#allocation7 + $0x178] sm:$0xf0]  ;;  %v1284_v8 = vor.u32 %v1539_v58, %v1281_v59  ;;  %v1537_v12 = vld [vmem:[#allocation7 + $0xe4] sm:$0xf] }
  0x44   :  { %795 = vmatpush.bf16.msrb.mxu3 %v1392_v10  ;;  %v1571_v10 = vld [vmem:[#allocation7 + $0x1f4] sm:$0xf]  ;;  %v1409_v11 = vld [vmem:[#allocation7 + $0x1f8] sm:$0xf0]  ;;  %v1273_v13 = vld [vmem:[#allocation7 + $0xe8] sm:$0xf0]  ;;  %v1352_v15 = vor.u32 %v1558_v5, %v1351_v2  ;;  %v1348_v16 = vor.u32 %v1555_v6, %v1345_v7 }
  0x45   :  { %757 = vmatpush.bf16.msrb.mxu0 %v1192_v9  ;;  %v1209_v9 = vld [vmem:[#allocation7 + $0x68] sm:$0xf0]  ;;  %v1412_v18 = vor.u32 %v1571_v10, %v1409_v11  ;;  %v1276_v19 = vor.u32 %v1537_v12, %v1273_v13  ;;  %v1265_v24 = vld [vmem:[#allocation7 + $0xd8] sm:$0xf0]  ;;  %v1569_v29 = vld [vmem:[#allocation7 + $0x1e4] sm:$0xf] }
  0x46   :  { %770 = vmatpush.bf16.msrb.mxu1 %v1256_v14  ;;  %v1288_v14 = vor.u32 %v1542_v1, %v1287_v0  ;;  %v1212_v17 = vor.u32 %v1521_v63, %v1209_v9  ;;  %v1337_v27 = vld [vmem:[#allocation7 + $0x168] sm:$0xf0]  ;;  %v1329_v39 = vld [vmem:[#allocation7 + $0x158] sm:$0xf0]  ;;  %v1567_v40 = vld [vmem:[#allocation7 + $0x1d4] sm:$0xf] }
  0x47   :  { %783 = vmatpush.bf16.msrb.mxu2 %v1320_v20  ;;  %v1519_v20 = vld [vmem:[#allocation7 + $0x54] sm:$0xf]  ;;  %v1401_v30 = vld [vmem:[#allocation7 + $0x1e8] sm:$0xf0]  ;;  %v1393_v42 = vld [vmem:[#allocation7 + $0x1d8] sm:$0xf0] }
  0x48   :  { %796 = vmatpush.bf16.msrb.mxu3 %v1384_v22  ;;  %v1535_v22 = vld [vmem:[#allocation7 + $0xd4] sm:$0xf]  ;;  %v1404_v31 = vor.u32 %v1569_v29, %v1401_v30  ;;  %v1257_v36 = vld [vmem:[#allocation7 + $0xc8] sm:$0xf0]  ;;  %v1396_v43 = vor.u32 %v1567_v40, %v1393_v42  ;;  %v1185_v45 = vld [vmem:[#allocation7 + $0x38] sm:$0xf0] }
  0x49   :  { %758 = vmatpush.bf16.msrb.mxu0 %v1184_v21  ;;  %v1201_v21 = vld [vmem:[#allocation7 + $0x58] sm:$0xf0]  ;;  %v1268_v25 = vor.u32 %v1535_v22, %v1265_v24  ;;  %v1549_v50 = vld [vmem:[#allocation7 + $0x144] sm:$0xf]  ;;  %v1385_v54 = vld [vmem:[#allocation7 + $0x1c8] sm:$0xf0] }
  0x4a   :  { %771 = vmatpush.bf16.msrb.mxu1 %v1248_v26  ;;  %v1204_v23 = vor.u32 %v1519_v20, %v1201_v21  ;;  %v1553_v26 = vld [vmem:[#allocation7 + $0x164] sm:$0xf]  ;;  %v1249_v48 = vld [vmem:[#allocation7 + $0xb8] sm:$0xf0]  ;;  %v1177_v57 = vld [vmem:[#allocation7 + $0x28] sm:$0xf0] }
  0x4b   :  { %784 = vmatpush.bf16.msrb.mxu2 %v1312_v32  ;;  %v1340_v28 = vor.u32 %v1553_v26, %v1337_v27  ;;  %v1517_v32 = vld [vmem:[#allocation7 + $0x44] sm:$0xf]  ;;  %v1313_v63 = vld [vmem:[#allocation7 + $0x138] sm:$0xf0]  ;;  %v1563_v0 = vld [vmem:[#allocation7 + $0x1b4] sm:$0xf] }
  0x4c   :  { %797 = vmatpush.bf16.msrb.mxu3 %v1376_v34  ;;  %v1533_v34 = vld [vmem:[#allocation7 + $0xc4] sm:$0xf]  ;;  %v1377_v2 = vld [vmem:[#allocation7 + $0x1b8] sm:$0xf0]  ;;  %v1527_v6 = vld [vmem:[#allocation7 + $0x94] sm:$0xf] }
  0x4d   :  { %759 = vmatpush.bf16.msrb.mxu0 %v1176_v33  ;;  %v1193_v33 = vld [vmem:[#allocation7 + $0x48] sm:$0xf0]  ;;  %v1260_v37 = vor.u32 %v1533_v34, %v1257_v36  ;;  %v1565_v52 = vld [vmem:[#allocation7 + $0x1c4] sm:$0xf]  ;;  %v1169_v5 = vld [vmem:[#allocation7 + $0x18] sm:$0xf0] }
  0x4e   :  { %772 = vmatpush.bf16.msrb.mxu1 %v1240_v38  ;;  %v1196_v35 = vor.u32 %v1517_v32, %v1193_v33  ;;  %v1551_v38 = vld [vmem:[#allocation7 + $0x154] sm:$0xf]  ;;  %v1388_v55 = vor.u32 %v1565_v52, %v1385_v54  ;;  %v1513_v56 = vld [vmem:[#allocation7 + $0x24] sm:$0xf]  ;;  %v1305_v10 = vld [vmem:[#allocation7 + $0x128] sm:$0xf0] }
  0x4f   :  { %785 = vmatpush.bf16.msrb.mxu2 %v1304_v44  ;;  %v1332_v41 = vor.u32 %v1551_v38, %v1329_v39  ;;  %v1515_v44 = vld [vmem:[#allocation7 + $0x34] sm:$0xf]  ;;  %v1529_v58 = vld [vmem:[#allocation7 + $0xa4] sm:$0xf]  ;;  %v1180_v59 = vor.u32 %v1513_v56, %v1177_v57  ;;  %v1361_v26 = vld [vmem:[#allocation7 + $0x198] sm:$0xf0] }
  0x50   :  { %798 = vmatpush.bf16.msrb.mxu3 %v1368_v47  ;;  %v1531_v47 = vld [vmem:[#allocation7 + $0xb4] sm:$0xf]  ;;  %v1545_v9 = vld [vmem:[#allocation7 + $0x124] sm:$0xf]  ;;  %v1289_v29 = vld [vmem:[#allocation7 + $0x108] sm:$0xf0] }
  0x51   :  { %760 = vmatpush.bf16.msrb.mxu0 %v1168_v46  ;;  %v1188_v46 = vor.u32 %v1515_v44, %v1185_v45  ;;  %v1252_v49 = vor.u32 %v1531_v47, %v1249_v48  ;;  %v1308_v12 = vor.u32 %v1545_v9, %v1305_v10  ;;  %v1561_v13 = vld [vmem:[#allocation7 + $0x1a4] sm:$0xf]  ;;  %v1543_v22 = vld [vmem:[#allocation7 + $0x114] sm:$0xf]  ;;  %v1353_v32 = vld [vmem:[#allocation7 + $0x188] sm:$0xf0] }
  0x52   :  { %773 = vmatpush.bf16.msrb.mxu1 %v1232_v51  ;;  %v1321_v51 = vld [vmem:[#allocation7 + $0x148] sm:$0xf0]  ;;  %v1559_v24 = vld [vmem:[#allocation7 + $0x194] sm:$0xf]  ;;  %v1557_v30 = vld [vmem:[#allocation7 + $0x184] sm:$0xf] }
  0x53   :  { %786 = vmatpush.bf16.msrb.mxu2 %v1296_v60  ;;  %v1324_v53 = vor.u32 %v1549_v50, %v1321_v51  ;;  %v1241_v60 = vld [vmem:[#allocation7 + $0xa8] sm:$0xf0]  ;;  %v1364_v27 = vor.u32 %v1559_v24, %v1361_v26  ;;  %v134_v33 = vld [vmem:[#allocation6] sm:$0xf]  ;;  %v1356_v34 = vor.u32 %v1557_v30, %v1353_v32  ;;  %v1579_v52 = vld [vmem:[#allocation9 + $0x30] sm:$0xff] }
  0x54   :  { %799 = vmatpush.bf16.msrb.mxu3 %v1360_v62  ;;  %v1547_v62 = vld [vmem:[#allocation7 + $0x134] sm:$0xf]  ;;  %v137_v36 = vperm.slane %v134_v33, 1  ;;  %v1580_v44 = vld [vmem:[#allocation9 + $0x38] sm:$0xff]  ;;  %v1582_v9 = vld [vmem:[#allocation9 + $0x48] sm:$0xff] }
  0x55   :  { %761 = vmatpush.bf16.msrb.mxu0 %v1160_v61  ;;  %v1244_v61 = vor.u32 %v1529_v58, %v1241_v60  ;;  %v1316_v1 = vor.u32 %v1547_v62, %v1313_v63  ;;  %v1578_v58 = vld [vmem:[#allocation9 + $0x28] sm:$0xff]  ;;  %v1577_v62 = vld [vmem:[#allocation9 + $0x20] sm:$0xff]  ;;  %v1588_v63 = vld [vmem:[#allocation9 + $0x78] sm:$0xff] }
  0x56   :  { %774 = vmatpush.bf16.msrb.mxu1 %v1224_v3  ;;  %v1380_v3 = vor.u32 %v1563_v0, %v1377_v2  ;;  %v1576_v0 = vld [vmem:[#allocation9 + $0x18] sm:$0xff]  ;;  %v1587_v2 = vld [vmem:[#allocation9 + $0x70] sm:$0xff] }
  0x57   :  { %787 = vmatpush.bf16.msrb.mxu2 %v1288_v14  ;;  %v1369_v14 = vld [vmem:[#allocation7 + $0x1a8] sm:$0xf0]  ;;  %v428_v10 = vld [vmem:[%s1806_s4] sm:$0x3] }
  0x58   :  { %800 = vmatpush.bf16.msrb.mxu3 %v1352_v15  ;;  %v1509_v15 = vld [vmem:[#allocation7 + $0x4] sm:$0xf] }
  0x59   :  { %806 = vmatpush.bf16.msra.mxu0 %v1220_v4  ;;  %v1511_v4 = vld [vmem:[#allocation7 + $0x14] sm:$0xf] }
  0x5a   :  { %819 = vmatpush.bf16.msra.mxu1 %v1284_v8  ;;  %v1172_v7 = vor.u32 %v1511_v4, %v1169_v5  ;;  %v1233_v8 = vld [vmem:[#allocation7 + $0x98] sm:$0xf0]  ;;  %v1586_v4 = vld [vmem:[#allocation9 + $0x68] sm:$0xff]  ;;  %v1573_v5 = vld [vmem:[#allocation9] sm:$0xff] }
  0x5b   :  { %832 = vmatpush.bf16.msra.mxu2 %v1348_v16  ;;  %v1236_v11 = vor.u32 %v1527_v6, %v1233_v8  ;;  %v1372_v16 = vor.u32 %v1561_v13, %v1369_v14  ;;  %v1585_v6 = vld [vmem:[#allocation9 + $0x60] sm:$0xff]  ;;  %v1583_v8 = vld [vmem:[#allocation9 + $0x50] sm:$0xff]  ;;  %v430_v13 = vperm.slane %v428_v10, 0 }
  0x5c   :  { %845 = vmatpush.bf16.msra.mxu3 %v1412_v18  ;;  %v1525_v18 = vld [vmem:[#allocation7 + $0x84] sm:$0xf] }
  0x5d   :  { %807 = vmatpush.bf16.msra.mxu0 %v1212_v17  ;;  %v1161_v17 = vld [vmem:[#allocation7 + $0x8] sm:$0xf0]  ;;  %v1581_v14 = vld [vmem:[#allocation9 + $0x40] sm:$0xff] }
  0x5e   :  { %820 = vmatpush.bf16.msra.mxu1 %v1276_v19  ;;  %v1225_v19 = vld [vmem:[#allocation7 + $0x88] sm:$0xf0]  ;;  %v1164_v20 = vor.u32 %v1509_v15, %v1161_v17 }
  0x5f   :  { %833 = vmatpush.bf16.msra.mxu2 %v1340_v28  ;;  %v1228_v21 = vor.u32 %v1525_v18, %v1225_v19  ;;  %v1541_v28 = vld [vmem:[#allocation7 + $0x104] sm:$0xf] }
  0x60   :  { %846 = vmatpush.bf16.msra.mxu3 %v1404_v31  ;;  %v1292_v31 = vor.u32 %v1541_v28, %v1289_v29 }
  0x61   :  { %808 = vmatpush.bf16.msra.mxu0 %v1204_v23  ;;  %v1297_v23 = vld [vmem:[#allocation7 + $0x118] sm:$0xf0] }
  0x62   :  { %821 = vmatpush.bf16.msra.mxu1 %v1268_v25  ;;  %v1300_v25 = vor.u32 %v1543_v22, %v1297_v23 }
  0x63   :  { %834 = vmatpush.bf16.msra.mxu2 %v1332_v41 }
  0x64   :  { %847 = vmatpush.bf16.msra.mxu3 %v1396_v43  ;;  %v138_v43 = vperm.slane %v134_v33, 2 }
  0x65   :  { %809 = vmatpush.bf16.msra.mxu0 %v1196_v35  ;;  %v136_v35 = vperm.slane %v134_v33, 0 }
  0x66   :  { %822 = vmatpush.bf16.msra.mxu1 %v1260_v37 }
  0x67   :  { %835 = vmatpush.bf16.msra.mxu2 %v1324_v53 }
  0x68   :  { %848 = vmatpush.bf16.msra.mxu3 %v1388_v55 }
  0x69   :  { %810 = vmatpush.bf16.msra.mxu0 %v1188_v46  ;;  %v139_v46 = vperm.slane %v134_v33, 3 }
  0x6a   :  { %823 = vmatpush.bf16.msra.mxu1 %v1252_v49 }
  0x6b   :  { %836 = vmatpush.bf16.msra.mxu2 %v1316_v1  ;;  %v1575_v1 = vld [vmem:[#allocation9 + $0x10] sm:$0xff] }
  0x6c   :  { %849 = vmatpush.bf16.msra.mxu3 %v1380_v3  ;;  %v1574_v3 = vld [vmem:[#allocation9 + $0x8] sm:$0xff] }
  0x6d   :  { %811 = vmatpush.bf16.msra.mxu0 %v1180_v59 }
  0x6e   :  { %824 = vmatpush.bf16.msra.mxu1 %v1244_v61 }
  0x6f   :  { %837 = vmatpush.bf16.msra.mxu2 %v1308_v12 }
  0x70   :  { %850 = vmatpush.bf16.msra.mxu3 %v1372_v16 }
  0x71   :  { %812 = vmatpush.bf16.msra.mxu0 %v1172_v7  ;;  %v1584_v7 = vld [vmem:[#allocation9 + $0x58] sm:$0xff] }
  0x72   :  { %825 = vmatpush.bf16.msra.mxu1 %v1236_v11 }
  0x73   :  { %838 = vmatpush.bf16.msra.mxu2 %v1300_v25 }
  0x74   :  { %851 = vmatpush.bf16.msra.mxu3 %v1364_v27  ;;  %v431_v27 = vperm.slane %v428_v10, 1 }
  0x75   :  { %813 = vmatpush.bf16.msra.mxu0 %v1164_v20 }
  0x76   :  { %826 = vmatpush.bf16.msra.mxu1 %v1228_v21 }
  0x77   :  { %839 = vmatpush.bf16.msra.mxu2 %v1292_v31 }
  0x78   :  { %852 = vmatpush.bf16.msra.mxu3 %v1356_v34 }
  0xb5   :  { %v313_v37 = vpop.f32.mrf.mxu0 }
  0xb6   :  { %v314_v38 = vadd.f32 %v313_v37, %v136_v35  ;;  %v326_v39 = vpop.f32.mrf.mxu1 }
  0xb7   :  { %v327_v40 = vadd.f32 %v326_v39, %v137_v36 }
  0xb8   :  { %v356_v41 = vmax.f32 %v314_v38, 0.0 }
  0xb9   :  { %v357_v42 = vmax.f32 %v327_v40, 0.0 }
  0xba   :  { %v360_v45 = vpack.c.bf16 %v356_v41, %v356_v41 }
  0xbb   :  { %v361_v47 = vpack.c.bf16 %v357_v42, %v357_v42 }
  0xbc   :  { %762 = vmatmul.bf16.vlgmr.msrb.gmra.mxu0 %v360_v45 }
  0xbd   :  { %v339_v48 = vpop.f32.mrf.mxu2  ;;  %775 = vmatmul.bf16.vlgmr.msrb.gmra.mxu1 %v361_v47  ;;  %v315_v51 = vpop.f32.mrf.mxu0  ;;  %994 = vmatpush.bf16.msrb.mxu0 %v1580_v44  ;;  %v1600_v44 = vld [vmem:[%s1808_s6] ss:$0 sm:$0xff] }
  0xbe   :  { %v340_v49 = vadd.f32 %v339_v48, %v138_v43  ;;  %v352_v50 = vpop.f32.mrf.mxu3  ;;  %v328_v54 = vpop.f32.mrf.mxu1  ;;  %1007 = vmatpush.bf16.msrb.mxu1 %v1588_v63 }
  0xbf   :  { %v353_v53 = vadd.f32 %v352_v50, %v139_v46 }
  0xc0   :  { %v358_v55 = vmax.f32 %v340_v49, 0.0 }
  0xc1   :  { %v359_v56 = vmax.f32 %v353_v53, 0.0  ;;  %995 = vmatpush.bf16.msrb.mxu0 %v1579_v52 }
  0xc2   :  { %v362_v57 = vpack.c.bf16 %v358_v55, %v358_v55  ;;  %1008 = vmatpush.bf16.msrb.mxu1 %v1587_v2 }
  0xc3   :  { %v363_v59 = vpack.c.bf16 %v359_v56, %v359_v56 }
  0xc4   :  { %788 = vmatmul.bf16.vlgmr.msrb.gmra.mxu2 %v362_v57 }
  0xc5   :  { %801 = vmatmul.bf16.vlgmr.msrb.gmra.mxu3 %v363_v59  ;;  %v341_v60 = vpop.f32.mrf.mxu2  ;;  %996 = vmatpush.bf16.msrb.mxu0 %v1578_v58 }
  0xc6   :  { %v354_v61 = vpop.f32.mrf.mxu3  ;;  %1009 = vmatpush.bf16.msrb.mxu1 %v1586_v4 }
  0xc9   :  { %997 = vmatpush.bf16.msrb.mxu0 %v1577_v62 }
  0xca   :  { %1010 = vmatpush.bf16.msrb.mxu1 %v1585_v6 }
  0xcc   :  { %814 = vmatmul.bf16.vlgmr.msra.gmra.mxu0 %v360_v45 }
  0xcd   :  { %827 = vmatmul.bf16.vlgmr.msra.gmra.mxu1 %v361_v47  ;;  %998 = vmatpush.bf16.msrb.mxu0 %v1576_v0 }
  0xce   :  { %1011 = vmatpush.bf16.msrb.mxu1 %v1584_v7 }
  0xd1   :  { %999 = vmatpush.bf16.msrb.mxu0 %v1575_v1 }
  0xd2   :  { %1012 = vmatpush.bf16.msrb.mxu1 %v1583_v8 }
  0xd4   :  { %840 = vmatmul.bf16.vlgmr.msra.gmra.mxu2 %v362_v57 }
  0xd5   :  { %853 = vmatmul.bf16.vlgmr.msra.gmra.mxu3 %v363_v59  ;;  %1000 = vmatpush.bf16.msrb.mxu0 %v1574_v3 }
  0xd6   :  { %1013 = vmatpush.bf16.msrb.mxu1 %v1582_v9 }
  0xd9   :  { %1001 = vmatpush.bf16.msrb.mxu0 %v1573_v5 }
  0xda   :  { %1014 = vmatpush.bf16.msrb.mxu1 %v1581_v14 }
 0x139   :  { %v763_v11 = vpop.f32.mrf.mxu0 }
 0x13a   :  { %v776_v12 = vpop.f32.mrf.mxu1  ;;  %v764_v15 = vadd.f32 %v763_v11, %v430_v13 }
 0x13c   :  { %v777_v18 = vadd.f32 %v776_v12, %v764_v15 }
 0x141   :  { %v765_v16 = vpop.f32.mrf.mxu0 }
 0x142   :  { %v778_v17 = vpop.f32.mrf.mxu1 }
 0x147   :  { %v789_v19 = vpop.f32.mrf.mxu2 }
 0x148   :  { %v790_v20 = vadd.f32 %v789_v19, %v777_v18  ;;  %v802_v21 = vpop.f32.mrf.mxu3 }
 0x149   :  { %v815_v23 = vpop.f32.mrf.mxu0 }
 0x14a   :  { %v803_v22 = vadd.f32 %v802_v21, %v790_v20  ;;  %v828_v24 = vpop.f32.mrf.mxu1  ;;  %v816_v30 = vadd.f32 %v815_v23, %v431_v27 }
 0x14c   :  { %v858_v25 = vmax.f32 %v803_v22, 0.0  ;;  %v829_v33 = vadd.f32 %v828_v24, %v816_v30 }
 0x14e   :  { %v860_v26 = vpack.c.bf16 %v858_v25, %v858_v25 }
 0x14f   :  { %v791_v28 = vpop.f32.mrf.mxu2 }
 0x150   :  { %v804_v29 = vpop.f32.mrf.mxu3  ;;  %1002 = vmatmul.bf16.vlgmr.msrb.gmra.mxu0 %v860_v26 }
 0x151   :  { %v817_v31 = vpop.f32.mrf.mxu0 }
 0x152   :  { %v830_v32 = vpop.f32.mrf.mxu1 }
 0x157   :  { %v841_v34 = vpop.f32.mrf.mxu2 }
 0x158   :  { %v842_v35 = vadd.f32 %v841_v34, %v829_v33  ;;  %v854_v36 = vpop.f32.mrf.mxu3 }
 0x15a   :  { %v855_v37 = vadd.f32 %v854_v36, %v842_v35 }
 0x15c   :  { %v859_v38 = vmax.f32 %v855_v37, 0.0 }
 0x15e   :  { %v861_v39 = vpack.c.bf16 %v859_v38, %v859_v38 }
 0x15f   :  { %v843_v40 = vpop.f32.mrf.mxu2 }
 0x160   :  { %v856_v41 = vpop.f32.mrf.mxu3  ;;  %1015 = vmatmul.bf16.vlgmr.msrb.gmra.mxu1 %v861_v39 }
 0x1cd   :  { %v1003_v42 = vpop.f32.mrf.mxu0 }
 0x1ce   :  { %v1004_v45 = vadd.f32 %v1600_v44, %v1003_v42 }
 0x1d5   :  { %v1005_v43 = vpop.f32.mrf.mxu0 }
 0x1dd   :  { %v1016_v46 = vpop.f32.mrf.mxu1 }
 0x1de   :  { %v1017_v47 = vadd.f32 %v1016_v46, %v1004_v45 }
 0x1e0   :  { %v1020_v48 = vpack.c.bf16 %v1017_v47, %v1017_v47 }
 0x1e2   :  { %1021 = vst [vmem:[%s1809_s7] sm:$0xf] %v1020_v48 }
 0x1e5   :  { %v1018_v49 = vpop.f32.mrf.mxu1 }
 0x1e6   :  { %1026 = vsyncpa [#allocation3], 1 }
 0x1e7   :  { %1027 = vsyncpa [#allocation5], 1 }
 0x1e8   :  { %1028 = vsyncpa [#allocation8], 1 }

</bundles_post_ra>
